<compile_context>
chip_gen: v6e
topology: v6e:2x2x1
jax: 0.10.0
libtpu: 0.0.40
codegen_flags: <defaults>
</compile_context>

<pallas_src>
import math

import jax
import jax.numpy as jnp
from jax.experimental import pallas as pl
from jax.experimental.pallas import tpu as pltpu

_SQRT_2_OVER_PI = 0.7978845608028654
_C1 = _SQRT_2_OVER_PI * 0.044715  # 0.035677408136300125

_LANES = 128
_TARGET_BLOCK_BYTES = 4 * 1024 * 1024  # ~4 MiB per block (x4 double-buffers = 16 MiB)
_VMEM_LIMIT_BYTES = 32 * 1024 * 1024   # explicit scoped-VMEM budget, safe on v5e/v6e/v7x


def _gelu_kernel(x_ref, o_ref):
    x = x_ref[...]
    xf = x.astype(jnp.float32)
    # 0.5 * x * (1 + tanh(sqrt(2/pi) * (x + 0.044715 * x^3)))
    # strength-reduced: inner = x * (c0 + c1 * x^2)
    inner = xf * (_SQRT_2_OVER_PI + _C1 * (xf * xf))
    t = jnp.tanh(inner)  # EUP, f32
    if o_ref.dtype == jnp.float32:
        o_ref[...] = 0.5 * xf * (1.0 + t)
    else:
        # Post-tanh arithmetic in the packed input dtype (bf16/f16): halves the
        # f32 VALU work per element, which matters for bf16 streaming on v7x.
        tn = t.astype(x.dtype)
        o_ref[...] = ((0.5 * x) * (1 + tn)).astype(o_ref.dtype)


def _cdiv(a: int, b: int) -> int:
    return (a + b - 1) // b


def _round_up(a: int, b: int) -> int:
    return _cdiv(a, b) * b


def _gelu_2d(x2d: jax.Array) -> jax.Array:
    """GELU over a lane-dense (rows, 128) slab."""
    rows = x2d.shape[0]
    dtype = x2d.dtype
    itemsize = jnp.dtype(dtype).itemsize
    n = rows * _LANES

    # Dtype-aware tile: target ~4 MiB blocks, rounded down to a multiple of 8 rows.
    tr_max = max(8, (_TARGET_BLOCK_BYTES // (_LANES * itemsize)) // 8 * 8)

    if rows <= 8:
        tr = rows  # block == full dim -> allowed even if < 8
    else:
        # Keep >= 2 grid steps whenever possible so v7x megacore has work for both TCs.
        tr = min(tr_max, max(8, _round_up(_cdiv(rows, 2), 8)))
        steps = _cdiv(rows, tr)
        # Small odd grids leave one v7x TensorCore idle for up to half the time:
        # round the step count up to even and rebalance the tile.
        if 2 < steps <= 16 and steps % 2 == 1:
            tr = min(tr_max, max(8, _round_up(_cdiv(rows, steps + 1), 8)))
    grid = (_cdiv(rows, tr),)

    return pl.pallas_call(
        _gelu_kernel,
        out_shape=jax.ShapeDtypeStruct((rows, _LANES), dtype),
        grid_spec=pltpu.PrefetchScalarGridSpec(
            num_scalar_prefetch=0,
            grid=grid,
            in_specs=[pl.BlockSpec((tr, _LANES), lambda i: (i, 0))],
            out_specs=pl.BlockSpec((tr, _LANES), lambda i: (i, 0)),
        ),
        compiler_params=pltpu.CompilerParams(
            dimension_semantics=("parallel",),
            vmem_limit_bytes=_VMEM_LIMIT_BYTES,
        ),
        cost_estimate=pl.CostEstimate(
            flops=8 * n,
            transcendentals=n,
            bytes_accessed=2 * n * itemsize,
        ),
    )(x2d)


def gelu_pallas(x: jax.Array) -> jax.Array:
    """Tanh-approx GELU. Intended to be called under jax.jit (see `gelu`)."""
    orig_shape = x.shape
    n = math.prod(orig_shape) if orig_shape else 1

    # Zero-sized input: nothing to do.
    if n == 0:
        return x

    flat = x.reshape(-1)
    n_main = (n // _LANES) * _LANES
    tail_len = n - n_main

    if tail_len == 0:
        # Fast path: already a multiple of 128 lanes, no pad/slice anywhere.
        out_flat = _gelu_2d(flat.reshape(n // _LANES, _LANES)).reshape(-1)
        return out_flat.reshape(orig_shape)

    # Ragged path: main body through the big kernel, <128-element tail through
    # a tiny (1,128) kernel call. Only the tail (one row) is padded/sliced.
    parts = []
    if n_main > 0:
        main_out = _gelu_2d(flat[:n_main].reshape(n_main // _LANES, _LANES))
        parts.append(main_out.reshape(-1))
    tail = flat[n_main:]
    tail_padded = jnp.pad(tail, (0, _LANES - tail_len))  # < 128 elements: negligible
    tail_out = _gelu_2d(tail_padded.reshape(1, _LANES)).reshape(-1)[:tail_len]
    parts.append(tail_out)

    out_flat = jnp.concatenate(parts) if len(parts) > 1 else parts[0]
    return out_flat.reshape(orig_shape)


# jitted entry point: keeps the wrapper reshapes/slices as metadata, not HBM passes.
gelu = jax.jit(gelu_pallas)


def gelu_ref(x: jax.Array) -> jax.Array:
    xf = x.astype(jnp.float32)
    y = 0.5 * xf * (1.0 + jnp.tanh(_SQRT_2_OVER_PI * (xf + 0.044715 * xf ** 3)))
    return y.astype(x.dtype)


if __name__ == "__main__":
    key = jax.random.PRNGKey(0)

    # Main case: matches the module's elementwise forward on a small activation.
    x = jax.random.normal(key, (2, 4, 16, 16), dtype=jnp.float32)
    out = gelu(x)
    jax.block_until_ready(out)
    ref = gelu_ref(x)
    assert out.shape == x.shape and out.dtype == x.dtype
    assert jnp.allclose(out, ref, atol=1e-5, rtol=1e-5)

    # Ragged-tail path (numel % 128 != 0).
    x2 = jax.random.normal(jax.random.PRNGKey(1), (3, 5, 7), dtype=jnp.float32)
    out2 = gelu(x2)
    jax.block_until_ready(out2)
    assert jnp.allclose(out2, gelu_ref(x2), atol=1e-5, rtol=1e-5)

    # bf16 path (packed post-tanh arithmetic branch).
    x3 = jax.random.normal(jax.random.PRNGKey(2), (4, 96), dtype=jnp.bfloat16)
    out3 = gelu(x3)
    jax.block_until_ready(out3)
    assert out3.dtype == jnp.bfloat16
    assert jnp.allclose(out3.astype(jnp.float32), gelu_ref(x3).astype(jnp.float32),
                        atol=2e-2, rtol=2e-2)

    print("KERNEL_OK")
</pallas_src>

<mosaic_0001>
module attributes {stable_mosaic.version = 11 : i64} {
  func.func @_gelu_kernel(%arg0: i32, %arg1: memref<8x128xf32, #tpu.memory_space<vmem>>, %arg2: memref<8x128xf32, #tpu.memory_space<vmem>>) attributes {dimension_semantics = [#tpu.dimension_semantics<parallel>], iteration_bounds = array<i64: 2>, scalar_prefetch = 0 : i64, scratch_operands = 0 : i64, tpu.core_type = #tpu.core_type<tc>, window_params = [{transform_indices = @transform_0, window_bounds = array<i64: 8, 128>}, {transform_indices = @transform_1, window_bounds = array<i64: 8, 128>}]} {
    %c0 = arith.constant 0 : index
    %c0_0 = arith.constant 0 : index
    %0 = vector.load %arg1[%c0, %c0_0] : memref<8x128xf32, #tpu.memory_space<vmem>>, vector<8x128xf32>
    %1 = arith.mulf %0, %0 : vector<8x128xf32>
    %cst = arith.constant 0.0356774069 : f32
    %2 = vector.broadcast %cst : f32 to vector<8x128xf32>
    %3 = arith.mulf %2, %1 : vector<8x128xf32>
    %cst_1 = arith.constant 0.797884583 : f32
    %4 = vector.broadcast %cst_1 : f32 to vector<8x128xf32>
    %5 = arith.addf %4, %3 : vector<8x128xf32>
    %6 = arith.mulf %0, %5 : vector<8x128xf32>
    %7 = math.tanh %6 : vector<8x128xf32>
    %cst_2 = arith.constant 5.000000e-01 : f32
    %8 = vector.broadcast %cst_2 : f32 to vector<8x128xf32>
    %9 = arith.mulf %8, %0 : vector<8x128xf32>
    %cst_3 = arith.constant 1.000000e+00 : f32
    %10 = vector.broadcast %cst_3 : f32 to vector<8x128xf32>
    %11 = arith.addf %10, %7 : vector<8x128xf32>
    %12 = arith.mulf %9, %11 : vector<8x128xf32>
    %c0_4 = arith.constant 0 : index
    %c0_5 = arith.constant 0 : index
    %13 = vector.load %arg2[%c0_4, %c0_5] : memref<8x128xf32, #tpu.memory_space<vmem>>, vector<8x128xf32>
    tpu.vector_store %arg2[%c0_4, %c0_5], %12 {strides = array<i32>} : memref<8x128xf32, #tpu.memory_space<vmem>>, vector<8x128xf32>,
    return
  }
  func.func @transform_0(%arg0: i32) -> (i32, i32) {
    %c0_i32 = arith.constant 0 : i32
    %c0_i32_0 = arith.constant 0 : i32
    return %arg0, %c0_i32 : i32, i32
  }
  func.func @transform_1(%arg0: i32) -> (i32, i32) {
    %c0_i32 = arith.constant 0 : i32
    %c0_i32_0 = arith.constant 0 : i32
    return %arg0, %c0_i32 : i32, i32
  }
}

</mosaic_0001>

<bundles_post_ra>
// kernel: gelu_pallas.1
= control target key start
LH: loop header
LB: loop body
LE: loop exit
PB: predicated region body
PF: predicated region fallthrough
CT: control target
= control target key end

     0   :  { %s198_s6 = smov 0   ;;  %s218_s0 = inlined_call_operand.vmem [shape: f32[16,128], index: 0, kind: input, shape index: {}]   ;;  %s219_s1 = inlined_call_operand.vmem [shape: f32[16,128], index: 1, kind: output, shape index: {}]  }
   0x1 LB: > { %s175_s7 = sadd.s32 4294967295, %s200_s6   ;;  %p179_p0 = scmp.ge.s32.totalorder %s200_s6, 1  ;;  %s200_s6 = sphi %s198_s6, %s11_s6  }
   0x2   : > { %p86_p1 = scmp.lt.s32.totalorder %s200_s6, 3 }
   0x4   : > { %p87_p2 = pnand %p179_p0, %p86_p1 }
   0x5   : > { %p104_p3 = scmp.lt.s32.totalorder (!%p87_p2), %s175_s7, 1 }
   0x6   : > { %90 = sbr.rel (%p87_p2) target bundleno = 42 (0x2a), region = 24 }
   0xb   : > { %s221_s7 = smov (!%p104_p3, %s175_s7), 1 }
   0xc   : > { %s180_s8 = sshll.u32 %s221_s7, 3 }
   0xd   : > { %s107_s11 = scalar_lea.vmem %s218_s0, %s180_s8  ;;  %s111_s14 = scalar_lea.vmem %s219_s1, %s180_s8 }
   0xe   : > { %v112_v0 = vld [vmem:[%s107_s11] sm:$0xff] }
   0xf   : > { %v113_v1 = vmul.f32 %v112_v0, %v112_v0  ;;  %v118_v5 = vmul.f32 0.5, %v112_v0 }
  0x11   : > { %v114_v2 = vmul.f32 0.035677407, %v113_v1 }
  0x13   : > { %v115_v3 = vadd.f32 0.7978846, %v114_v2 }
  0x15   : > { %v116_v4 = vmul.f32 %v115_v3, %v112_v0 }
  0x17   : > { %192 = vtanh.f32 %v116_v4 }
  0x24   : > { %v193_v6 = vpop.eup %192 }
  0x25   : > { %v119_v7 = vadd.f32 1.0, %v193_v6 }
  0x27   : > { %v120_v8 = vmul.f32 %v119_v7, %v118_v5 }
  0x29   : > { %121 = vst [vmem:[%s111_s14] sm:$0xff] %v120_v8 }
  0x2a PF: > { %s11_s6 = sadd.s32 1, %s200_s6  }
  0x2b   : > { %p8_p4 = scmp.ge.s32.totalorder %s11_s6, 4  }
  0x2d   :  { %10 = sbr.rel (!%p8_p4) target bundleno = 1 (0x1), region = 54 }

</bundles_post_ra>
